<compile_context>
chip_gen: v7x
topology: tpu7x:2x2x1
jax: 0.10.0
libtpu: 0.0.40
codegen_flags: <defaults>
</compile_context>

<pallas_src>
import functools

import jax
import jax.numpy as jnp
from jax.experimental import pallas as pl
from jax.experimental.pallas import tpu as pltpu


# Below this many FLOPs the pallas_call fixed overhead is a net loss; let XLA
# fuse the matmul+bias instead (override with force_kernel=True).
_KERNEL_MIN_FLOPS = 1 << 22


def _round_up(v, m):
    return -(-v // m) * m


def _sublane_granule(dtype):
    # 8 rows per vreg sublane tile for 4-byte, 16 for 2-byte, 32 for 1-byte.
    return max(8, 32 // jnp.dtype(dtype).itemsize)


def _vmem_budget():
    """Returns (working_set_budget_bytes, vmem_limit_bytes) gated by generation."""
    cap = None
    try:
        info = pltpu.get_tpu_info()
        for attr in ("vmem_capacity_bytes", "vmem_size_bytes", "vmem_bytes"):
            cap = getattr(info, attr, None)
            if cap:
                break
    except Exception:
        cap = None
    if not cap:
        # Unknown part: stay inside every generation's scoped-VMEM default.
        return 12 << 20, None
    if cap >= (100 << 20):
        # v5e / v6e: 128 MiB physical VMEM.
        return 48 << 20, 96 << 20
    # v7x: 64 MiB physical per TensorCore -> keep pipeline working set modest.
    return 24 << 20, 48 << 20


def _fh_kernel_resident(x_ref, w_ref, b_ref, o_ref, *, compute_dtype):
    # x_ref: (tm, K_pad)  activations (original dtype; cast here, not in glue)
    # w_ref: (K_pad, tn)  resident weight column (compute dtype)
    # b_ref: (1, tn)      bias (f32)
    # o_ref: (tm, tn)     output tile
    x = x_ref[...]
    if compute_dtype is not None:
        x = x.astype(compute_dtype)
    acc = jnp.dot(x, w_ref[...], preferred_element_type=jnp.float32)
    o_ref[...] = (acc + b_ref[...]).astype(o_ref.dtype)


def _fh_kernel_ktiled(x_ref, w_ref, b_ref, o_ref, acc_ref, *, compute_dtype):
    # Fallback path for very large K: f32 VMEM accumulator across the K axis.
    k = pl.program_id(2)

    @pl.when(k == 0)
    def _():
        acc_ref[...] = jnp.zeros_like(acc_ref)

    x = x_ref[...]
    if compute_dtype is not None:
        x = x.astype(compute_dtype)
    acc_ref[...] += jnp.dot(x, w_ref[...], preferred_element_type=jnp.float32)

    @pl.when(k == pl.num_programs(2) - 1)
    def _():
        o_ref[...] = (acc_ref[...] + b_ref[...]).astype(o_ref.dtype)


def prepare_flatten_head_params(weight, bias, *, compute_dtype=jnp.bfloat16,
                                force_k_tiling=False):
    """One-time parameter prep (do this OUTSIDE the hot path).

    weight: (target_window, num_features)  -- PyTorch nn.Linear layout
    bias:   (target_window,)

    Transposes the weight to (K, N) once, casts it to `compute_dtype`
    (default bf16 for the MXU; pass None for exact f32), zero-pads K/N up to
    tile-friendly multiples, and keeps the bias in f32.
    """
    target_window, num_features = weight.shape
    K, N = num_features, target_window

    budget, vmem_limit = _vmem_budget()

    # Tile-then-pad for N (one-time weight pad, lane-dense output stores).
    tn = 256 if N >= 256 else 128
    N_pad = _round_up(N, tn)

    w_dtype = compute_dtype if compute_dtype is not None else weight.dtype
    w_item = jnp.dtype(w_dtype).itemsize

    # Resident-weight / collapsed-K decision: a double-buffered (K_pad, tn)
    # weight column must stay within a fraction of the working-set budget.
    K_128 = _round_up(K, 128)
    collapse_k = (not force_k_tiling) and (2 * K_128 * tn * w_item <= budget // 3)

    if collapse_k:
        tk = K_pad = K_128
    else:
        tk = min(2048, _round_up(K, 256))
        K_pad = _round_up(K, tk)

    w_kn = weight.T.astype(w_dtype)            # (K, N), transposed/cast ONCE
    if (K_pad, N_pad) != (K, N):
        w_kn = jnp.pad(w_kn, ((0, K_pad - K), (0, N_pad - N)))

    b_pad = bias.astype(jnp.float32)
    if N_pad != N:
        b_pad = jnp.pad(b_pad, (0, N_pad - N))
    b_pad = b_pad.reshape(1, N_pad)

    return {
        "w_kn": w_kn,            # (K_pad, N_pad) in compute dtype
        "bias": b_pad,           # (1, N_pad) f32
        "K": K, "N": N,
        "tk": tk, "tn": tn,
        "collapse_k": collapse_k,
        "compute_dtype": compute_dtype,
        "budget": budget,
        "vmem_limit": vmem_limit,
    }


def _pick_m_tile(M, granule, cap, fits):
    """Pick tm (multiple of `granule`, <= cap, passing fits) and M_pad."""
    M_g = _round_up(M, granule)
    cap = max(granule, (cap // granule) * granule)

    # 1) Largest granule-multiple dividing the granule-padded M (no per-call
    #    padding of x beyond the sublane granule).
    best = 0
    t = granule
    while t <= min(cap, M_g):
        if M_g % t == 0 and fits(t):
            best = t
        t += granule
    if best >= min(128, M_g):
        return best, M_g

    # 2) Divisor search degenerated (awkward M): tile-then-pad with a modest
    #    tile so the tail pad stays small but grid steps stay few.
    t = min(cap, 256)
    t = max(granule, (t // granule) * granule)
    while t > granule and not fits(t):
        t -= granule
    if best and best > t:
        return best, M_g
    return t, _round_up(M, t)


def flatten_head_apply(x, params, b, f, *, force_kernel=False):
    """x: (b*f, p, n) with p*n == num_features. Returns (b, f, target_window)."""
    bf_, p, n = x.shape
    assert bf_ == b * f, "leading dim must equal b*f"
    K, N = params["K"], params["N"]
    assert p * n == K, "p*n must equal num_features"

    M = bf_
    K_pad, N_pad = params["w_kn"].shape
    tk, tn = params["tk"], params["tn"]
    cd = params["compute_dtype"]
    collapse_k = params["collapse_k"]
    budget = params["budget"]
    vmem_limit = params["vmem_limit"]
    out_dtype = x.dtype

    # Glue: flatten last two dims (== Flatten(start_dim=-2) after rearrange).
    x2d = x.reshape(M, K)

    # Tiny-problem bypass: fixed pallas_call overhead is a net loss here.
    if not force_kernel and 2 * M * K * N < _KERNEL_MIN_FLOPS:
        xb = x2d.astype(cd) if cd is not None else x2d
        out2d = jnp.dot(
            xb, params["w_kn"][:K, :N], preferred_element_type=jnp.float32
        ) + params["bias"][0, :N]
        return out2d.astype(out_dtype).reshape(b, f, N)

    x_item = jnp.dtype(x2d.dtype).itemsize
    w_item = jnp.dtype(params["w_kn"].dtype).itemsize
    o_item = jnp.dtype(out_dtype).itemsize
    granule = _sublane_granule(x2d.dtype)

    if collapse_k:
        # Double-buffered x + W column + out tile must fit the budget.
        def fits(tm):
            return 2 * (tm * K_pad * x_item + K_pad * tn * w_item
                        + tm * tn * o_item) <= budget
    else:
        # Double-buffered tiles + f32 accumulator scratch.
        def fits(tm):
            return (2 * (tm * tk * x_item + tk * tn * w_item + tm * tn * o_item)
                    + tm * tn * 4) <= budget

    tm, M_pad = _pick_m_tile(M, granule, 512, fits)

    gi = M_pad // tm
    gj = N_pad // tn
    # v7x megacore: nudge the parallel block count to an even number so both
    # TensorCores stay busy (harmless on single-core v5e/v6e).
    if (gi * gj) % 2 == 1 and gi * gj > 1 and tm % (2 * granule) == 0:
        tm //= 2
        gi = M_pad // tm

    # TODO(synk): handle the ragged M/K tail in-kernel (mask / pl.BoundedSlice)
    # instead of materializing a padded copy of x when tails are tiny.
    if (M_pad, K_pad) != (M, K):
        x2d = jnp.pad(x2d, ((0, M_pad - M), (0, K_pad - K)))

    bytes_accessed = (
        x2d.size * x_item
        + params["w_kn"].size * w_item
        + params["bias"].size * 4
        + M_pad * N_pad * o_item
    )
    cost = pl.CostEstimate(
        flops=2 * M_pad * K_pad * N_pad,
        transcendentals=0,
        bytes_accessed=bytes_accessed,
    )
    compiler_params = pltpu.CompilerParams(
        dimension_semantics=(("parallel", "parallel") if collapse_k
                             else ("parallel", "parallel", "arbitrary")),
        vmem_limit_bytes=vmem_limit,
    )

    if collapse_k:
        # Grid (N blocks outermost, M blocks innermost): the weight column is
        # fetched once per j and reused across every i -> |W| streamed once.
        out_pad = pl.pallas_call(
            functools.partial(_fh_kernel_resident, compute_dtype=cd),
            out_shape=jax.ShapeDtypeStruct((M_pad, N_pad), out_dtype),
            grid_spec=pltpu.PrefetchScalarGridSpec(
                num_scalar_prefetch=0,
                grid=(gj, gi),
                in_specs=[
                    pl.BlockSpec((tm, K_pad), lambda j, i: (i, 0)),   # x strip
                    pl.BlockSpec((K_pad, tn), lambda j, i: (0, j)),   # W column
                    pl.BlockSpec((1, tn), lambda j, i: (0, j)),       # bias
                ],
                out_specs=pl.BlockSpec((tm, tn), lambda j, i: (i, j)),
            ),
            compiler_params=compiler_params,
            cost_estimate=cost,
        )(x2d, params["w_kn"], params["bias"])
    else:
        gk = K_pad // tk
        out_pad = pl.pallas_call(
            functools.partial(_fh_kernel_ktiled, compute_dtype=cd),
            out_shape=jax.ShapeDtypeStruct((M_pad, N_pad), out_dtype),
            grid_spec=pltpu.PrefetchScalarGridSpec(
                num_scalar_prefetch=0,
                grid=(gi, gj, gk),
                in_specs=[
                    pl.BlockSpec((tm, tk), lambda i, j, k: (i, k)),
                    pl.BlockSpec((tk, tn), lambda i, j, k: (k, j)),
                    pl.BlockSpec((1, tn), lambda i, j, k: (0, j)),
                ],
                out_specs=pl.BlockSpec((tm, tn), lambda i, j, k: (i, j)),
                scratch_shapes=[pltpu.VMEM((tm, tn), jnp.float32)],
            ),
            compiler_params=compiler_params,
            cost_estimate=cost,
        )(x2d, params["w_kn"], params["bias"])

    # Glue: strip padding, reshape (b*f, N) -> (b, f, N).
    out2d = out_pad[:M, :N]
    return out2d.reshape(b, f, N)


def flatten_head(x, weight, bias, b, f, *, compute_dtype=jnp.bfloat16,
                 force_kernel=False):
    """Convenience one-shot wrapper (for repeated use, call
    prepare_flatten_head_params() once and flatten_head_apply() per step)."""
    params = prepare_flatten_head_params(weight, bias, compute_dtype=compute_dtype)
    return flatten_head_apply(x, params, b, f, force_kernel=force_kernel)


if __name__ == "__main__":
    # Small shapes consistent with the module.
    b, f, p, n = 2, 4, 8, 16
    num_features = p * n          # 128
    target_window = 32

    key = jax.random.PRNGKey(0)
    kx, kw, kb = jax.random.split(key, 3)

    # Deterministic synthetic parameters (PyTorch Linear-style uniform init).
    bound = 1.0 / jnp.sqrt(num_features)
    x = jax.random.normal(kx, (b * f, p, n), dtype=jnp.float32)
    weight = jax.random.uniform(kw, (target_window, num_features),
                                minval=-bound, maxval=bound, dtype=jnp.float32)
    bias = jax.random.uniform(kb, (target_window,),
                              minval=-bound, maxval=bound, dtype=jnp.float32)

    # Reference in plain JAX (same math as the PyTorch module).
    ref = x.reshape(b, f, num_features) @ weight.T + bias

    # 1) Resident-weight / collapsed-K path with exact f32 compute.
    params_f32 = prepare_flatten_head_params(weight, bias, compute_dtype=None)
    out_f32 = jax.block_until_ready(
        flatten_head_apply(x, params_f32, b, f, force_kernel=True))
    assert out_f32.shape == (b, f, target_window)
    assert jnp.allclose(out_f32, ref, atol=1e-5, rtol=1e-5)

    # 2) Same path with the default bf16 MXU compute (looser tolerance expected).
    params_bf16 = prepare_flatten_head_params(weight, bias)
    out_bf16 = jax.block_until_ready(
        flatten_head_apply(x, params_bf16, b, f, force_kernel=True))
    assert out_bf16.shape == (b, f, target_window)
    assert jnp.allclose(out_bf16, ref, atol=5e-2, rtol=5e-2)

    # 3) K-tiled accumulator fallback path (forced), exact f32 compute.
    params_kt = prepare_flatten_head_params(weight, bias, compute_dtype=None,
                                            force_k_tiling=True)
    out_kt = jax.block_until_ready(
        flatten_head_apply(x, params_kt, b, f, force_kernel=True))
    assert out_kt.shape == (b, f, target_window)
    assert jnp.allclose(out_kt, ref, atol=1e-5, rtol=1e-5)

    print("KERNEL_OK")
</pallas_src>

<mosaic_0001>
module attributes {stable_mosaic.version = 11 : i64} {
  func.func @_fh_kernel_resident(%arg0: i32, %arg1: i32, %arg2: memref<8x128xf32, #tpu.memory_space<vmem>>, %arg3: memref<128x128xf32, #tpu.memory_space<vmem>>, %arg4: memref<1x128xf32, #tpu.memory_space<vmem>>, %arg5: memref<8x128xf32, #tpu.memory_space<vmem>>) attributes {dimension_semantics = [#tpu.dimension_semantics<parallel>, #tpu.dimension_semantics<parallel>], iteration_bounds = array<i64: 1, 1>, scalar_prefetch = 0 : i64, scratch_operands = 0 : i64, tpu.core_type = #tpu.core_type<tc>, window_params = [{transform_indices = @transform_0, window_bounds = array<i64: 8, 128>}, {transform_indices = @transform_1, window_bounds = array<i64: 128, 128>}, {transform_indices = @transform_2, window_bounds = array<i64: 1, 128>}, {transform_indices = @transform_3, window_bounds = array<i64: 8, 128>}]} {
    %c0 = arith.constant 0 : index
    %c0_0 = arith.constant 0 : index
    %0 = vector.load %arg2[%c0, %c0_0] : memref<8x128xf32, #tpu.memory_space<vmem>>, vector<8x128xf32>
    %c0_1 = arith.constant 0 : index
    %c0_2 = arith.constant 0 : index
    %1 = vector.load %arg3[%c0_1, %c0_2] : memref<128x128xf32, #tpu.memory_space<vmem>>, vector<128x128xf32>
    %cst = arith.constant dense<0.000000e+00> : vector<8x128xf32>
    %2 = tpu.matmul %0, %1, %cst {dimension_numbers = #tpu.dot_dimension_numbers<[1], [0], [0], [1], [0, 0, 1, 1], [], []>} : vector<8x128xf32>, vector<128x128xf32>, vector<8x128xf32> -> vector<8x128xf32>
    %c0_3 = arith.constant 0 : index
    %c0_4 = arith.constant 0 : index
    %3 = vector.load %arg4[%c0_3, %c0_4] : memref<1x128xf32, #tpu.memory_space<vmem>>, vector<1x128xf32>
    %4 = vector.broadcast %3 : vector<1x128xf32> to vector<8x128xf32>
    %5 = arith.addf %2, %4 : vector<8x128xf32>
    %c0_5 = arith.constant 0 : index
    %c0_6 = arith.constant 0 : index
    %6 = vector.load %arg5[%c0_5, %c0_6] : memref<8x128xf32, #tpu.memory_space<vmem>>, vector<8x128xf32>
    tpu.vector_store %arg5[%c0_5, %c0_6], %5 {strides = array<i32>} : memref<8x128xf32, #tpu.memory_space<vmem>>, vector<8x128xf32>,
    return
  }
  func.func @transform_0(%arg0: i32, %arg1: i32) -> (i32, i32) {
    %c0_i32 = arith.constant 0 : i32
    %c0_i32_0 = arith.constant 0 : i32
    return %arg1, %c0_i32 : i32, i32
  }
  func.func @transform_1(%arg0: i32, %arg1: i32) -> (i32, i32) {
    %c0_i32 = arith.constant 0 : i32
    %c0_i32_0 = arith.constant 0 : i32
    return %c0_i32, %arg0 : i32, i32
  }
  func.func @transform_2(%arg0: i32, %arg1: i32) -> (i32, i32) {
    %c0_i32 = arith.constant 0 : i32
    %c0_i32_0 = arith.constant 0 : i32
    return %c0_i32, %arg0 : i32, i32
  }
  func.func @transform_3(%arg0: i32, %arg1: i32) -> (i32, i32) {
    %c0_i32 = arith.constant 0 : i32
    return %arg1, %arg0 : i32, i32
  }
}

</mosaic_0001>

<bundles_post_ra>
// kernel: tpu_custom_call.1
= control target key start
LH: loop header
LB: loop body
LE: loop exit
PB: predicated region body
PF: predicated region fallthrough
CT: control target
= control target key end

     0   :  { %8 = vsyncpa [#allocation3], 0  ;;  %s383_s0 = inlined_call_operand.hbm [shape: f32[8,128], index: 0, kind: input, shape index: {}]   ;;  %s384_s1 = inlined_call_operand.hbm [shape: f32[128,128], index: 1, kind: input, shape index: {}]   ;;  %s385_s2 = inlined_call_operand.vmem [shape: f32[1,128], index: 2, kind: input, shape index: {}]   ;;  %s386_s3 = inlined_call_operand.hbm [shape: f32[8,128], index: 3, kind: output, shape index: {}]  }
   0x1   :  { %9 = vsyncpa [#allocation6], 0 }
   0x2   :  { %10 = vsyncpa [#allocation4], 0  ;;  %s309_s12 = smov [#allocation2]   ;;  %s310_s14 = smov [#allocation5]  }
   0x3   :  { %s17_s13 = sshll.u32 %s309_s12, 4  ;;  %s26_s15 = sshll.u32 %s310_s14, 4  ;;  %s18_s13 = int_to_ptr.vmem [resolvable:$true] %s17_s13  ;;  %s337_s15 = int_to_ptr.vmem [resolvable:$true] %s26_s15 }
   0x4   :  { %s237_s18 = scalar_lea.hbm %s383_s0, 128 }
   0x5   :  { %p238_p0 = scmp.ne.s32.totalorder %s383_s0, %s237_s18  ;;  %p241_p1 = scmp.lt.u32.totalorder %s237_s18, %s383_s0 }
   0x7   :  { %p243_p2 = pnand %p241_p1, %p238_p0 }
   0x9   :  { %246 = shalt.err (!%p243_p2)
}
   0xa   :  { %s247_s23 = scalar_lea.vmem %s18_s13, 128  ;;  %p252_p4 = scmp.lt.s32.totalorder %s18_s13, %s18_s13 }
   0xb   :  { %p248_p3 = scmp.ne.s32.totalorder %s18_s13, %s247_s23  ;;  %p253_p5 = scmp.lt.s32.totalorder %s247_s23, %s247_s23 }
   0xd   :  { %p254_p6 = por %p253_p5, %p252_p4 }
   0xf   :  { %p255_p7 = pnand %p254_p6, %p248_p3 }
  0x11   :  { %258 = shalt.err (!%p255_p7)
}
  0x12   :  { %20 = dma.hbm_to_vmem [thread:$0]  %s383_s0, 128, %s18_s13, [#allocation3]  }
  0x13   :  { %s259_s28 = scalar_lea.hbm %s384_s1, 2048 }
  0x14   :  { %p260_p8 = scmp.ne.s32.totalorder %s384_s1, %s259_s28  ;;  %p263_p9 = scmp.lt.u32.totalorder %s259_s28, %s384_s1 }
  0x16   :  { %p265_p10 = pnand %p263_p9, %p260_p8 }
  0x18   :  { %268 = shalt.err (!%p265_p10)
}
  0x19   :  { %s269_s6 = scalar_lea.vmem %s337_s15, 2048  ;;  %p274_p12 = scmp.lt.s32.totalorder %s337_s15, %s337_s15 }
  0x1a   :  { %p270_p11 = scmp.ne.s32.totalorder %s337_s15, %s269_s6  ;;  %p275_p13 = scmp.lt.s32.totalorder %s269_s6, %s269_s6 }
  0x1c   :  { %p276_p0 = por %p275_p13, %p274_p12 }
  0x1e   :  { %p277_p1 = pnand %p276_p0, %p270_p11 }
  0x20   :  { %280 = shalt.err (!%p277_p1)
}
  0x21   :  { %s311_s0 = smov 128   ;;  %s312_s7 = smov 8  }
  0x22   :  { %32 = dma.hbm_to_vmem [thread:$0]  %s384_s1, 2048, %s337_s15, [#allocation6], %s311_s0, %s311_s0, %s312_s7  }
  0x23   :  { %303 = dma.done.wait [#allocation3], 128  }
  0x24   :  { %304 = vsyncadd [#allocation3], 4294967168 }
  0x25   :  { %305 = dma.done.wait [#allocation6], 2048  }
  0x26   :  { %306 = vsyncadd [#allocation6], 4294965248  ;;  %v313_v0 = vmov 0.0|0.0   ;;  %vm314_vm0 = vmmov 0   ;;  %v315_v1 = vmov 0.0   ;;  %v42_v2 = vld [vmem:[#allocation5] sm:$0xff] }
  0x27   :  { %205 = vmatprep.subr.bf16.mxu0 %v313_v0  ;;  %202 = vmatprep.mubr.msk.f32.mxu0 %vm314_vm0, %v315_v1  ;;  %v43_v3 = vld [vmem:[#allocation5 + $0x8] sm:$0xff]  ;;  %v44_v4 = vld [vmem:[#allocation5 + $0x10] sm:$0xff]  ;;  %v45_v6 = vld [vmem:[#allocation5 + $0x18] sm:$0xff]  ;;  %s316_s11 = smov [#allocation7]  }
  0x28   :  { %v206_v5 = vpack.c.bf16 %v43_v3, %v42_v2  ;;  %v209_v7 = vpack.c.bf16 %v45_v6, %v44_v4  ;;  %v46_v8 = vld [vmem:[#allocation5 + $0x20] sm:$0xff]  ;;  %v47_v9 = vld [vmem:[#allocation5 + $0x28] sm:$0xff]  ;;  %v48_v11 = vld [vmem:[#allocation5 + $0x30] sm:$0xff]  ;;  %s142_s12 = sshll.u32 %s316_s11, 4  ;;  %s143_s12 = int_to_ptr.vmem [resolvable:$true] %s142_s12 }
  0x29   :  { %v212_v10 = vpack.c.bf16 %v47_v9, %v46_v8  ;;  %v49_v12 = vld [vmem:[#allocation5 + $0x38] sm:$0xff]  ;;  %v50_v14 = vld [vmem:[#allocation5 + $0x40] sm:$0xff]  ;;  %v51_v15 = vld [vmem:[#allocation5 + $0x48] sm:$0xff]  ;;  %s281_s13 = scalar_lea.vmem %s143_s12, 128  ;;  %p286_p3 = scmp.lt.s32.totalorder %s143_s12, %s143_s12 }
  0x2a   :  { %207 = vmatpush3.bf16.msra.mxu0 %v206_v5  ;;  %v215_v13 = vpack.c.bf16 %v49_v12, %v48_v11  ;;  %v218_v16 = vpack.c.bf16 %v51_v15, %v50_v14  ;;  %v52_v17 = vld [vmem:[#allocation5 + $0x50] sm:$0xff]  ;;  %v53_v18 = vld [vmem:[#allocation5 + $0x58] sm:$0xff]  ;;  %v54_v20 = vld [vmem:[#allocation5 + $0x60] sm:$0xff]  ;;  %p282_p2 = scmp.ne.s32.totalorder %s143_s12, %s281_s13  ;;  %p287_p4 = scmp.lt.s32.totalorder %s281_s13, %s281_s13 }
  0x2b   :  { %208 = vmatprep.subr.bf16.mxu0 %v313_v0  ;;  %v221_v19 = vpack.c.bf16 %v53_v18, %v52_v17  ;;  %v55_v21 = vld [vmem:[#allocation5 + $0x68] sm:$0xff]  ;;  %v56_v23 = vld [vmem:[#allocation5 + $0x70] sm:$0xff]  ;;  %v57_v24 = vld [vmem:[#allocation5 + $0x78] sm:$0xff] }
  0x2c   :  { %v224_v22 = vpack.c.bf16 %v55_v21, %v54_v20  ;;  %v227_v25 = vpack.c.bf16 %v57_v24, %v56_v23  ;;  %v41_v26 = vld [vmem:[#allocation2] sm:$0xff]  ;;  %p288_p5 = por %p287_p4, %p286_p3 }
  0x2d   :  { %v152_v27 = vld [vmem:[%s385_s2] ss:$0 sm:$0xff] }
  0x2e   :  { %210 = vmatpush3.bf16.msra.mxu0 %v209_v7  ;;  %p289_p6 = pnand %p288_p5, %p282_p2 }
  0x2f   :  { %211 = vmatprep.subr.bf16.mxu0 %v313_v0 }
  0x32   :  { %213 = vmatpush3.bf16.msra.mxu0 %v212_v10 }
  0x33   :  { %214 = vmatprep.subr.bf16.mxu0 %v313_v0 }
  0x36   :  { %216 = vmatpush3.bf16.msra.mxu0 %v215_v13 }
  0x37   :  { %217 = vmatprep.subr.bf16.mxu0 %v313_v0 }
  0x3a   :  { %219 = vmatpush3.bf16.msra.mxu0 %v218_v16 }
  0x3b   :  { %220 = vmatprep.subr.bf16.mxu0 %v313_v0 }
  0x3e   :  { %222 = vmatpush3.bf16.msra.mxu0 %v221_v19 }
  0x3f   :  { %223 = vmatprep.subr.bf16.mxu0 %v313_v0 }
  0x42   :  { %225 = vmatpush3.bf16.msra.mxu0 %v224_v22 }
  0x43   :  { %226 = vmatprep.subr.bf16.mxu0 %v313_v0 }
  0x46   :  { %228 = vmatpush3.bf16.msra.mxu0 %v227_v25 }
  0x49   :  { %203 = vmatmul.mubr.f32.vlgmr.msra.gmra.mrb[0].mxu0 %v41_v26 }
 0x11c   :  { %v131_v28 = vpop.f32.mrb[0].mxu0 }
 0x11d   :  { %v132_v29 = vadd.f32 %v152_v27, %v131_v28  ;;  %v204_v30 = vpop.f32.mrb[1].mxu0 }
 0x11f   :  { %135 = vst [vmem:[#allocation7] sm:$0xff] %v132_v29 }
 0x120   :  { %292 = shalt.err (!%p289_p6)
}
 0x121   :  { %s293_s16 = scalar_lea.hbm %s386_s3, 128 }
 0x122   :  { %p294_p7 = scmp.ne.s32.totalorder %s386_s3, %s293_s16  ;;  %p297_p8 = scmp.lt.u32.totalorder %s293_s16, %s386_s3 }
 0x124   :  { %p299_p9 = pnand %p297_p8, %p294_p7 }
 0x126   :  { %302 = shalt.err (!%p299_p9)
}
 0x127   :  { %145 = dma.vmem_to_hbm [thread:$0]  %s143_s12, 128, %s386_s3, [#allocation4]  }
 0x128   :  { %307 = dma.done.wait [#allocation4], 128  }
 0x129   :  { %308 = vsyncadd [#allocation4], 4294967168 }
 0x12a   :  { %149 = vsyncpa [#allocation3], 1 }
 0x12b   :  { %150 = vsyncpa [#allocation6], 1 }
 0x12c   :  { %151 = vsyncpa [#allocation4], 1 }

</bundles_post_ra>
